<compile_context>
chip_gen: v7x
topology: tpu7x:2x2x1
jax: 0.10.0
libtpu: 0.0.40
codegen_flags: <defaults>
</compile_context>

<pallas_src>
import jax
import jax.numpy as jnp
from jax.experimental import pallas as pl
from jax.experimental.pallas import tpu as pltpu

NEG_SLOPE = 0.01        # nn.LeakyReLU default
IN_FEATURES = 28 * 28   # 784
CONV_OUT = 3
NUM_CLASSES = 10
DEFAULT_TILE = 1024     # batch rows per grid step (bf16 => ~1.5 MiB / buffer)


def convnet_kernel(x_ref, wconv_ref, bconv_ref, wlin_ref, blin_ref, out_ref):
    # x_ref:     (TILE, 784)  bf16, flattened NCHW image (C=1)
    # wconv_ref: (784, 3)     bf16, conv weight flattened & transposed
    # bconv_ref: (1, 3)       f32, conv bias
    # wlin_ref:  (3, 10)      f32, linear weight transposed
    # blin_ref:  (1, 10)      f32, linear bias
    # out_ref:   (TILE, 10)   f32, log-probabilities
    x = x_ref[...]            # bf16
    wc = wconv_ref[...]       # bf16

    # Conv2d(1, 3, (28, 28)) on a 28x28 input == full-image dot product.
    # bf16 inputs, f32 accumulation on the MXU.
    conv = (
        jnp.dot(x, wc, preferred_element_type=jnp.float32)
        + bconv_ref[...]
    )  # (TILE, 3) f32  == flatten of (TILE, 3, 1, 1)

    # LeakyReLU (negative_slope = 0.01), f32 on the VPU.
    act = jnp.where(conv >= 0, conv, NEG_SLOPE * conv)

    # Linear(3, 10): K=3, N=10 is far too small to be worth an MXU pass;
    # do it as 3 broadcast FMAs on the VPU (bias folded into the same pass).
    w = wlin_ref[...]         # (3, 10) f32
    logits = (
        blin_ref[...]
        + act[:, 0:1] * w[0:1, :]
        + act[:, 1:2] * w[1:2, :]
        + act[:, 2:3] * w[2:3, :]
    )  # (TILE, 10) f32

    # log_softmax over dim=1 (max-shifted, numerically stable).
    m = jnp.max(logits, axis=1, keepdims=True)
    shifted = logits - m
    lse = jnp.log(jnp.sum(jnp.exp(shifted), axis=1, keepdims=True))
    out_ref[...] = shifted - lse


def my_conv_net_forward(x_nchw, w_conv, b_conv, w_lin, b_lin, *, tile=DEFAULT_TILE):
    """x_nchw: (N, 1, 28, 28) float32. Returns (N, 10) float32 log-probs."""
    n = x_nchw.shape[0]

    # Wrapper-side reshapes (layout plumbing, not hot-path compute).
    x_flat = x_nchw.reshape(n, IN_FEATURES).astype(jnp.bfloat16)            # (N, 784)
    w_conv_flat = w_conv.reshape(CONV_OUT, IN_FEATURES).T.astype(jnp.bfloat16)  # (784, 3)
    b_conv_2d = b_conv.reshape(1, CONV_OUT).astype(jnp.float32)             # (1, 3)
    w_lin_t = w_lin.T.astype(jnp.float32)                                   # (3, 10)
    b_lin_2d = b_lin.reshape(1, NUM_CLASSES).astype(jnp.float32)            # (1, 10)

    # Clamp the tile for small batches; keep the sublane dim a multiple of 8.
    tile_n = min(tile, max(8, ((n + 7) // 8) * 8))
    grid = (pl.cdiv(n, tile_n),)

    # Advisory cost hint for XLA's scheduler.
    cost = pl.CostEstimate(
        flops=2 * n * IN_FEATURES * CONV_OUT + 2 * n * CONV_OUT * NUM_CLASSES,
        transcendentals=n * (NUM_CLASSES + 1),  # exp per class + log per row
        bytes_accessed=(
            n * IN_FEATURES * 2                 # x stream (bf16)
            + IN_FEATURES * CONV_OUT * 2        # conv weight (bf16)
            + (CONV_OUT + CONV_OUT * NUM_CLASSES + NUM_CLASSES) * 4  # small params
            + n * NUM_CLASSES * 4               # output (f32)
        ),
    )

    # Weight/bias blocks pin to block (0, 0) for every grid step -> resident in
    # VMEM across the whole batch sweep; only x / out are streamed.
    return pl.pallas_call(
        convnet_kernel,
        out_shape=jax.ShapeDtypeStruct((n, NUM_CLASSES), jnp.float32),
        grid=grid,
        in_specs=[
            pl.BlockSpec((tile_n, IN_FEATURES), lambda i: (i, 0)),
            pl.BlockSpec((IN_FEATURES, CONV_OUT), lambda i: (0, 0)),
            pl.BlockSpec((1, CONV_OUT), lambda i: (0, 0)),
            pl.BlockSpec((CONV_OUT, NUM_CLASSES), lambda i: (0, 0)),
            pl.BlockSpec((1, NUM_CLASSES), lambda i: (0, 0)),
        ],
        out_specs=pl.BlockSpec((tile_n, NUM_CLASSES), lambda i: (i, 0)),
        compiler_params=pltpu.CompilerParams(
            dimension_semantics=("parallel",),   # shard batch across TCs on v7x
        ),
        cost_estimate=cost,
    )(x_flat, w_conv_flat, b_conv_2d, w_lin_t, b_lin_2d)


def _reference_forward(x_nchw, w_conv, b_conv, w_lin, b_lin):
    """Pure-JAX f32 reference matching the PyTorch module."""
    n = x_nchw.shape[0]
    x_flat = x_nchw.reshape(n, IN_FEATURES)
    conv = x_flat @ w_conv.reshape(CONV_OUT, IN_FEATURES).T + b_conv[None, :]
    act = jnp.where(conv >= 0, conv, NEG_SLOPE * conv)
    logits = act @ w_lin.T + b_lin[None, :]
    return jax.nn.log_softmax(logits, axis=1)


if __name__ == "__main__":
    key = jax.random.PRNGKey(0)
    k_x, k_wc, k_bc, k_wl, k_bl = jax.random.split(key, 5)

    # Input: batch=2, 1 channel, 28x28 (required so conv output is 1x1 and
    # Linear(3, 10) shape-checks, matching the PyTorch module).
    x = jax.random.normal(k_x, (2, 1, 28, 28), dtype=jnp.float32)

    # Deterministic synthetic parameters (shapes from the module __init__).
    w_conv = jax.random.normal(k_wc, (3, 1, 28, 28), dtype=jnp.float32) * 0.05
    b_conv = jax.random.normal(k_bc, (3,), dtype=jnp.float32) * 0.05
    w_lin = jax.random.normal(k_wl, (10, 3), dtype=jnp.float32) * 0.5
    b_lin = jax.random.normal(k_bl, (10,), dtype=jnp.float32) * 0.5

    out = my_conv_net_forward(x, w_conv, b_conv, w_lin, b_lin)
    jax.block_until_ready(out)

    assert out.shape == (2, 10)

    # Sanity check 1: rows of exp(log_softmax) sum to 1.
    row_sums = jnp.sum(jnp.exp(out), axis=1)
    assert bool(jnp.all(jnp.abs(row_sums - 1.0) < 1e-4))

    # Sanity check 2: matches the f32 reference up to bf16 input-quantization
    # error on the 784-deep reduction (accumulation is f32).
    ref = _reference_forward(x, w_conv, b_conv, w_lin, b_lin)
    assert bool(jnp.max(jnp.abs(out - ref)) < 5e-2)

    print("KERNEL_OK")
</pallas_src>

<mosaic_0001>
module attributes {stable_mosaic.version = 11 : i64} {
  func.func @convnet_kernel(%arg0: i32, %arg1: memref<8x784xbf16, #tpu.memory_space<vmem>>, %arg2: memref<784x3xbf16, #tpu.memory_space<vmem>>, %arg3: memref<1x3xf32, #tpu.memory_space<vmem>>, %arg4: memref<3x10xf32, #tpu.memory_space<vmem>>, %arg5: memref<1x10xf32, #tpu.memory_space<vmem>>, %arg6: memref<8x10xf32, #tpu.memory_space<vmem>>) attributes {dimension_semantics = [#tpu.dimension_semantics<parallel>], iteration_bounds = array<i64: 1>, scalar_prefetch = 0 : i64, scratch_operands = 0 : i64, tpu.core_type = #tpu.core_type<tc>, window_params = [{transform_indices = @transform_0, window_bounds = array<i64: 8, 784>}, {pipeline_mode = #tpu.pipeline_mode<synchronous>, transform_indices = @transform_1, window_bounds = array<i64: 784, 3>}, {pipeline_mode = #tpu.pipeline_mode<synchronous>, transform_indices = @transform_2, window_bounds = array<i64: 1, 3>}, {pipeline_mode = #tpu.pipeline_mode<synchronous>, transform_indices = @transform_3, window_bounds = array<i64: 3, 10>}, {pipeline_mode = #tpu.pipeline_mode<synchronous>, transform_indices = @transform_4, window_bounds = array<i64: 1, 10>}, {transform_indices = @transform_5, window_bounds = array<i64: 8, 10>}]} {
    %c0 = arith.constant 0 : index
    %c0_0 = arith.constant 0 : index
    %0 = vector.load %arg1[%c0, %c0_0] : memref<8x784xbf16, #tpu.memory_space<vmem>>, vector<8x784xbf16>
    %c0_1 = arith.constant 0 : index
    %c0_2 = arith.constant 0 : index
    %1 = vector.load %arg2[%c0_1, %c0_2] : memref<784x3xbf16, #tpu.memory_space<vmem>>, vector<784x3xbf16>
    %cst = arith.constant dense<0.000000e+00> : vector<8x3xf32>
    %2 = tpu.matmul %0, %1, %cst {dimension_numbers = #tpu.dot_dimension_numbers<[1], [0], [0], [1], [0, 0, 1, 1], [], []>} : vector<8x784xbf16>, vector<784x3xbf16>, vector<8x3xf32> -> vector<8x3xf32>
    %c0_3 = arith.constant 0 : index
    %c0_4 = arith.constant 0 : index
    %3 = vector.load %arg3[%c0_3, %c0_4] : memref<1x3xf32, #tpu.memory_space<vmem>>, vector<1x3xf32>
    %4 = vector.broadcast %3 : vector<1x3xf32> to vector<8x3xf32>
    %5 = arith.addf %2, %4 : vector<8x3xf32>
    %cst_5 = arith.constant 0.000000e+00 : f32
    %6 = vector.broadcast %cst_5 : f32 to vector<8x3xf32>
    %7 = arith.cmpf oge, %5, %6 : vector<8x3xf32>
    %cst_6 = arith.constant 0.00999999977 : f32
    %8 = vector.broadcast %cst_6 : f32 to vector<8x3xf32>
    %9 = arith.mulf %8, %5 : vector<8x3xf32>
    %10 = arith.select %7, %5, %9 : vector<8x3xi1>, vector<8x3xf32>
    %c0_7 = arith.constant 0 : index
    %c0_8 = arith.constant 0 : index
    %11 = vector.load %arg4[%c0_7, %c0_8] : memref<3x10xf32, #tpu.memory_space<vmem>>, vector<3x10xf32>
    %c0_9 = arith.constant 0 : index
    %c0_10 = arith.constant 0 : index
    %12 = vector.load %arg5[%c0_9, %c0_10] : memref<1x10xf32, #tpu.memory_space<vmem>>, vector<1x10xf32>
    %13 = vector.extract_strided_slice %10 {offsets = [0, 0], sizes = [8, 1], strides = [1, 1]} : vector<8x3xf32> to vector<8x1xf32>
    %14 = vector.extract_strided_slice %11 {offsets = [0, 0], sizes = [1, 10], strides = [1, 1]} : vector<3x10xf32> to vector<1x10xf32>
    %15 = vector.broadcast %13 : vector<8x1xf32> to vector<8x10xf32>
    %16 = vector.broadcast %14 : vector<1x10xf32> to vector<8x10xf32>
    %17 = arith.mulf %15, %16 : vector<8x10xf32>
    %18 = vector.broadcast %12 : vector<1x10xf32> to vector<8x10xf32>
    %19 = arith.addf %18, %17 : vector<8x10xf32>
    %20 = vector.extract_strided_slice %10 {offsets = [0, 1], sizes = [8, 1], strides = [1, 1]} : vector<8x3xf32> to vector<8x1xf32>
    %21 = vector.extract_strided_slice %11 {offsets = [1, 0], sizes = [1, 10], strides = [1, 1]} : vector<3x10xf32> to vector<1x10xf32>
    %22 = vector.broadcast %20 : vector<8x1xf32> to vector<8x10xf32>
    %23 = vector.broadcast %21 : vector<1x10xf32> to vector<8x10xf32>
    %24 = arith.mulf %22, %23 : vector<8x10xf32>
    %25 = arith.addf %19, %24 : vector<8x10xf32>
    %26 = vector.extract_strided_slice %10 {offsets = [0, 2], sizes = [8, 1], strides = [1, 1]} : vector<8x3xf32> to vector<8x1xf32>
    %27 = vector.extract_strided_slice %11 {offsets = [2, 0], sizes = [1, 10], strides = [1, 1]} : vector<3x10xf32> to vector<1x10xf32>
    %28 = vector.broadcast %26 : vector<8x1xf32> to vector<8x10xf32>
    %29 = vector.broadcast %27 : vector<1x10xf32> to vector<8x10xf32>
    %30 = arith.mulf %28, %29 : vector<8x10xf32>
    %31 = arith.addf %25, %30 : vector<8x10xf32>
    %cst_11 = arith.constant dense<0xFF800000> : vector<8xf32>
    %32 = vector.multi_reduction <maximumf>, %31, %cst_11 [1] : vector<8x10xf32> to vector<8xf32>
    %33 = vector.shape_cast %32 : vector<8xf32> to vector<8x1xf32>
    %34 = vector.broadcast %33 : vector<8x1xf32> to vector<8x10xf32>
    %35 = arith.subf %31, %34 : vector<8x10xf32>
    %36 = math.exp %35 : vector<8x10xf32>
    %cst_12 = arith.constant dense<0.000000e+00> : vector<8xf32>
    %37 = vector.multi_reduction <add>, %36, %cst_12 [1] : vector<8x10xf32> to vector<8xf32>
    %38 = vector.shape_cast %37 : vector<8xf32> to vector<8x1xf32>
    %39 = math.log %38 : vector<8x1xf32>
    %40 = vector.broadcast %39 : vector<8x1xf32> to vector<8x10xf32>
    %41 = arith.subf %35, %40 : vector<8x10xf32>
    %c0_13 = arith.constant 0 : index
    %c0_14 = arith.constant 0 : index
    %42 = vector.load %arg6[%c0_13, %c0_14] : memref<8x10xf32, #tpu.memory_space<vmem>>, vector<8x10xf32>
    tpu.vector_store %arg6[%c0_13, %c0_14], %41 {strides = array<i32>} : memref<8x10xf32, #tpu.memory_space<vmem>>, vector<8x10xf32>,
    return
  }
  func.func @transform_0(%arg0: i32) -> (i32, i32) {
    %c0_i32 = arith.constant 0 : i32
    %c0_i32_0 = arith.constant 0 : i32
    return %arg0, %c0_i32 : i32, i32
  }
  func.func @transform_1(%arg0: i32) -> (i32, i32) {
    %c0_i32 = arith.constant 0 : i32
    %c0_i32_0 = arith.constant 0 : i32
    %c0_i32_1 = arith.constant 0 : i32
    return %c0_i32, %c0_i32_0 : i32, i32
  }
  func.func @transform_2(%arg0: i32) -> (i32, i32) {
    %c0_i32 = arith.constant 0 : i32
    %c0_i32_0 = arith.constant 0 : i32
    %c0_i32_1 = arith.constant 0 : i32
    return %c0_i32, %c0_i32_0 : i32, i32
  }
  func.func @transform_3(%arg0: i32) -> (i32, i32) {
    %c0_i32 = arith.constant 0 : i32
    %c0_i32_0 = arith.constant 0 : i32
    %c0_i32_1 = arith.constant 0 : i32
    return %c0_i32, %c0_i32_0 : i32, i32
  }
  func.func @transform_4(%arg0: i32) -> (i32, i32) {
    %c0_i32 = arith.constant 0 : i32
    %c0_i32_0 = arith.constant 0 : i32
    %c0_i32_1 = arith.constant 0 : i32
    return %c0_i32, %c0_i32_0 : i32, i32
  }
  func.func @transform_5(%arg0: i32) -> (i32, i32) {
    %c0_i32 = arith.constant 0 : i32
    %c0_i32_0 = arith.constant 0 : i32
    return %arg0, %c0_i32 : i32, i32
  }
}

</mosaic_0001>

<bundles_post_ra>
// kernel: tpu_custom_call.1
= control target key start
LH: loop header
LB: loop body
LE: loop exit
PB: predicated region body
PF: predicated region fallthrough
CT: control target
= control target key end

     0   :  { %10 = vsyncpa [#allocation3], 0  ;;  %v142_v30 = vlaneseq  ;;  %v960_v38 = vmov 1966171168   ;;  %v961_v40 = vmov 0.0   ;;  %vm962_vm0 = vmmov 0   ;;  %s1188_s0 = inlined_call_operand.vmem [shape: bf16[2,784], index: 0, kind: input, shape index: {}]   ;;  %s1189_s1 = inlined_call_operand.vmem [shape: bf16[784,3], index: 1, kind: input, shape index: {}]   ;;  %s1190_s2 = inlined_call_operand.vmem [shape: f32[1,3], index: 2, kind: input, shape index: {}]   ;;  %s1191_s3 = inlined_call_operand.vmem [shape: f32[3,10], index: 3, kind: input, shape index: {}]   ;;  %s1192_s4 = inlined_call_operand.vmem [shape: f32[1,10], index: 4, kind: input, shape index: {}]   ;;  %s1193_s5 = inlined_call_operand.hbm [shape: f32[2,10], index: 5, kind: output, shape index: {}]  }
   0x1   :  { %v877_v0 = vld [vmem:[%s1189_s1 + $0x40] sm:$0xff]   ;;  %v881_v4 = vld [vmem:[%s1189_s1 + $0x48] sm:$0xff]   ;;  %v885_v8 = vld [vmem:[%s1189_s1 + $0x50] sm:$0xff]   ;;  %v140_v39 = vunpack.c.l.s4 %v960_v38  ;;  %vm502_vm1 = vcmask 130048   ;;  %vm708_vm3 = vcmask 80896  }
   0x2   :  { %v878_v1 = vld [vmem:[%s1189_s1] sm:$0xff]   ;;  %790 = vmatprep.subr.bf16.mxu0 %v877_v0  ;;  %v882_v5 = vld [vmem:[%s1189_s1 + $0x8] sm:$0xff]   ;;  %v886_v9 = vld [vmem:[%s1189_s1 + $0x10] sm:$0xff]   ;;  %v1095_v33 = vshrl.u32 %v142_v30, 7 }
   0x3   :  { %v879_v2 = vld [vmem:[%s1189_s1 + $0xc0] sm:$0xff]   ;;  %791 = vmatpush3.bf16.msra.mxu0 %v878_v1  ;;  %v883_v6 = vld [vmem:[%s1189_s1 + $0xc8] sm:$0xff]   ;;  %v887_v10 = vld [vmem:[%s1189_s1 + $0xd0] sm:$0xff]   ;;  %v141_v42 = vunpack.c.0.s8 %v140_v39 }
   0x4   :  { %v880_v3 = vld [vmem:[%s1189_s1 + $0x80] sm:$0xff]   ;;  %812 = vmatprep.subr.bf16.mxu1 %v879_v2  ;;  %792 = vmatprep.subr.bf16.mxu0 %v881_v4  ;;  %v884_v7 = vld [vmem:[%s1189_s1 + $0x88] sm:$0xff]   ;;  %v888_v11 = vld [vmem:[%s1189_s1 + $0x90] sm:$0xff]  }
   0x5   :  { %813 = vmatpush3.bf16.msra.mxu1 %v880_v3  ;;  %v889_v12 = vld [vmem:[%s1189_s1 + $0x58] sm:$0xff]   ;;  %v893_v16 = vld [vmem:[%s1189_s1 + $0x60] sm:$0xff]   ;;  %v897_v20 = vld [vmem:[%s1189_s1 + $0x68] sm:$0xff]   ;;  %v144_v43 = vsub.s32 %v141_v42, %v1095_v33 }
   0x6   :  { %814 = vmatprep.subr.bf16.mxu1 %v883_v6  ;;  %v890_v13 = vld [vmem:[%s1189_s1 + $0x18] sm:$0xff]   ;;  %v894_v17 = vld [vmem:[%s1189_s1 + $0x20] sm:$0xff]   ;;  %v898_v21 = vld [vmem:[%s1189_s1 + $0x28] sm:$0xff]  }
   0x7   :  { %793 = vmatpush3.bf16.msra.mxu0 %v882_v5  ;;  %v891_v14 = vld [vmem:[%s1189_s1 + $0xd8] sm:$0xff]   ;;  %v895_v18 = vld [vmem:[%s1189_s1 + $0xe0] sm:$0xff]   ;;  %v899_v22 = vld [vmem:[%s1189_s1 + $0xe8] sm:$0xff]  }
   0x8   :  { %794 = vmatprep.subr.bf16.mxu0 %v885_v8  ;;  %v892_v15 = vld [vmem:[%s1189_s1 + $0x98] sm:$0xff]   ;;  %v896_v19 = vld [vmem:[%s1189_s1 + $0xa0] sm:$0xff]   ;;  %v900_v23 = vld [vmem:[%s1189_s1 + $0xa8] sm:$0xff]  }
   0x9   :  { %815 = vmatpush3.bf16.msra.mxu1 %v884_v7  ;;  %v901_v24 = vld [vmem:[%s1189_s1 + $0x70] sm:$0xff]   ;;  %v905_v28 = vld [vmem:[%s1189_s1 + $0x78] sm:$0xff]   ;;  %v915_v34 = vld [vmem:[%s1189_s1 + $0x140] sm:$0xff]  }
   0xa   :  { %816 = vmatprep.subr.bf16.mxu1 %v887_v10  ;;  %v902_v25 = vld [vmem:[%s1189_s1 + $0x30] sm:$0xff]   ;;  %v906_v29 = vld [vmem:[%s1189_s1 + $0x38] sm:$0xff]   ;;  %v908_v35 = vld [vmem:[%s1188_s0] ss:$7 sps:$4 sm:$0xff]  }
   0xb   :  { %795 = vmatpush3.bf16.msra.mxu0 %v886_v9  ;;  %v903_v26 = vld [vmem:[%s1189_s1 + $0xf0] sm:$0xff]   ;;  %v907_v31 = vld [vmem:[%s1189_s1 + $0xf8] sm:$0xff]   ;;  %v910_v36 = vld [vmem:[%s1188_s0 + $0x4] ss:$7 sps:$4 sm:$0x77]   ;;  %v145_v44 = vrot.slane %v908_v35, %v144_v43 }
   0xc   :  { %796 = vmatprep.subr.bf16.mxu0 %v889_v12  ;;  %v904_v27 = vld [vmem:[%s1189_s1 + $0xb0] sm:$0xff]   ;;  %v914_v32 = vld [vmem:[%s1189_s1 + $0xb8] sm:$0xff]   ;;  %v152_v46 = vrot.slane %v910_v36, %v144_v43  ;;  %v916_v53 = vld [vmem:[%s1189_s1 + $0x100] sm:$0xff]   ;;  %v964_v12 = vmov 0  }
   0xd   :  { %817 = vmatpush3.bf16.msra.mxu1 %v888_v11  ;;  %v913_v37 = vld [vmem:[%s1188_s0 + $0x12] ss:$7 sps:$4 sm:$0x77]   ;;  %v911_v41 = vld [vmem:[%s1188_s0 + $0xe] ss:$7 sps:$4 sm:$0xff]   ;;  %v931_v62 = vld [vmem:[%s1189_s1 + $0x180] sm:$0xff]   ;;  %873 = vset.pattern.permute.xlu0 %v964_v12 }
   0xe   :  { %818 = vmatprep.subr.bf16.mxu1 %v891_v14  ;;  %v159_v45 = vrot.slane %v911_v41, %v144_v43  ;;  %v166_v47 = vrot.slane %v913_v37, %v144_v43  ;;  %v917_v54 = vld [vmem:[%s1189_s1 + $0x148] sm:$0xff]   ;;  %v919_v60 = vld [vmem:[%s1189_s1 + $0x150] sm:$0xff]   ;;  %v921_v0 = vld [vmem:[%s1189_s1 + $0x158] sm:$0xff]   ;;  %v963_v11 = vmov 2   ;;  %v678_v41 = vsub.s32 0, %v1095_v33 }
   0xf   :  { %797 = vmatpush3.bf16.msra.mxu0 %v890_v13  ;;  %v918_v59 = vld [vmem:[%s1189_s1 + $0x108] sm:$0xff]   ;;  %v920_v63 = vld [vmem:[%s1189_s1 + $0x110] sm:$0xff]   ;;  %v922_v2 = vld [vmem:[%s1189_s1 + $0x118] sm:$0xff]   ;;  %875 = vset.pattern.permute.xlu1 %v963_v11 }
  0x10   :  { %798 = vmatprep.subr.bf16.mxu0 %v893_v16  ;;  %v168_v48 = vcombine.high %v145_v44, %v159_v45  ;;  %v167_v49 = vcombine.low %v145_v44, %v159_v45  ;;  %v170_v50 = vcombine.high %v152_v46, %v166_v47  ;;  %v169_v55 = vcombine.low %v152_v46, %v166_v47  ;;  %v923_v3 = vld [vmem:[%s1189_s1 + $0x160] sm:$0xff]   ;;  %v925_v5 = vld [vmem:[%s1189_s1 + $0x168] sm:$0xff]   ;;  %v927_v7 = vld [vmem:[%s1189_s1 + $0x170] sm:$0xff]  }
  0x11   :  { %819 = vmatpush3.bf16.msra.mxu1 %v892_v15  ;;  %v924_v4 = vld [vmem:[%s1189_s1 + $0x120] sm:$0xff]   ;;  %v926_v6 = vld [vmem:[%s1189_s1 + $0x128] sm:$0xff]   ;;  %v928_v8 = vld [vmem:[%s1189_s1 + $0x130] sm:$0xff]   ;;  %v694_v44 = vsub.s32 1, %v1095_v33  ;;  %v704_v45 = vsub.s32 2, %v1095_v33 }
  0x12   :  { %820 = vmatprep.subr.bf16.mxu1 %v895_v18  ;;  %v191_v51 = vrot.slane %v168_v48, %v144_v43  ;;  %v177_v52 = vrot.slane %v167_v49, %v144_v43  ;;  %v198_v58 = vrot.slane %v170_v50, %v144_v43  ;;  %v184_v61 = vrot.slane %v169_v55, %v144_v43  ;;  %v929_v9 = vld [vmem:[%s1189_s1 + $0x178] sm:$0xff]   ;;  %v738_v14 = vld [vmem:[%s1190_s2] ss:$0 sm:$0xff] }
  0x13   :  { %799 = vmatpush3.bf16.msra.mxu0 %v894_v17  ;;  %v930_v10 = vld [vmem:[%s1189_s1 + $0x138] sm:$0xff]   ;;  %v669_v42 = vld [vmem:[%s1191_s3] sm:$0x7] }
  0x14   :  { %800 = vmatprep.subr.bf16.mxu0 %v897_v20  ;;  %538 = vmatprep.mubr.bf16.mxu0 %v191_v51  ;;  %v201_v56 = vcombine.high %v191_v51, %v191_v51  ;;  %v199_v57 = vcombine.high %v177_v52, %v177_v52  ;;  %v200_v1 = vcombine.high %v184_v61, %v184_v61  ;;  %v789_v49 = vld [vmem:[%s1192_s4] ss:$0 sm:$0xff] }
  0x15   :  { %821 = vmatpush3.bf16.msra.mxu1 %v896_v19  ;;  %v679_v43 = vrot.slane %v669_v42, %v678_v41  ;;  %v695_v48 = vrot.slane %v669_v42, %v694_v44  ;;  %v705_v50 = vrot.slane %v669_v42, %v704_v45 }
  0x16   :  { %822 = vmatprep.subr.bf16.mxu1 %v899_v22  ;;  %578 = vmatprep.mubr.bf16.mxu1 %v201_v56 }
  0x17   :  { %801 = vmatpush3.bf16.msra.mxu0 %v898_v21 }
  0x18   :  { %802 = vmatprep.subr.bf16.mxu0 %v901_v24 }
  0x19   :  { %823 = vmatpush3.bf16.msra.mxu1 %v900_v23 }
  0x1a   :  { %824 = vmatprep.subr.bf16.mxu1 %v903_v26 }
  0x1b   :  { %803 = vmatpush3.bf16.msra.mxu0 %v902_v25 }
  0x1c   :  { %804 = vmatprep.subr.bf16.mxu0 %v905_v28 }
  0x1d   :  { %825 = vmatpush3.bf16.msra.mxu1 %v904_v27 }
  0x1e   :  { %826 = vmatprep.subr.bf16.mxu1 %v907_v31 }
  0x1f   :  { %805 = vmatpush3.bf16.msra.mxu0 %v906_v29 }
  0x20   :  { %834 = vmatprep.subr.bf16.mxu0 %v915_v34 }
  0x21   :  { %827 = vmatpush3.bf16.msra.mxu1 %v914_v32 }
  0x22   :  { %858 = vmatprep.subr.bf16.mxu1 %v961_v40  ;;  %539 = vmatmul.mubr.bf16.vlgmr.msra.gmra.mrb[0].mxu0 %v177_v52 }
  0x23   :  { %835 = vmatpush3.bf16.msra.mxu0 %v916_v53  ;;  %618 = vmatprep.mubr.bf16.mxu0 %v198_v58 }
  0x24   :  { %579 = vmatmul.mubr.bf16.vlgmr.msra.gmra.mrb[0].mxu1 %v199_v57  ;;  %836 = vmatprep.subr.bf16.mxu0 %v917_v54 }
  0x25   :  { %860 = vmatprep.mubr.msk.bf16.mxu1 %vm962_vm0, %v961_v40  ;;  %859 = vmatpush3.bf16.msra.mxu1 %v931_v62  ;;  %v965_v40 = vmov 1  }
  0x27   :  { %837 = vmatpush3.bf16.msra.mxu0 %v918_v59 }
  0x28   :  { %838 = vmatprep.subr.bf16.mxu0 %v919_v60 }
  0x2b   :  { %839 = vmatpush3.bf16.msra.mxu0 %v920_v63 }
  0x2c   :  { %840 = vmatprep.subr.bf16.mxu0 %v921_v0  ;;  %861 = vmatmul.mubr.msk.bf16.vlgmr.msra.gmra.mrb[4].mxu1 %vm502_vm1, %v200_v1 }
  0x2f   :  { %841 = vmatpush3.bf16.msra.mxu0 %v922_v2 }
  0x30   :  { %842 = vmatprep.subr.bf16.mxu0 %v923_v3 }
  0x33   :  { %843 = vmatpush3.bf16.msra.mxu0 %v924_v4 }
  0x34   :  { %844 = vmatprep.subr.bf16.mxu0 %v925_v5 }
  0x37   :  { %845 = vmatpush3.bf16.msra.mxu0 %v926_v6 }
  0x38   :  { %846 = vmatprep.subr.bf16.mxu0 %v927_v7 }
  0x3b   :  { %847 = vmatpush3.bf16.msra.mxu0 %v928_v8 }
  0x3c   :  { %848 = vmatprep.subr.bf16.mxu0 %v929_v9 }
  0x3f   :  { %849 = vmatpush3.bf16.msra.mxu0 %v930_v10 }
  0x42   :  { %619 = vmatmul.mubr.bf16.vlgmr.msra.gmra.mrb[4].mxu0 %v184_v61 }
  0xf5   :  { %v806_v13 = vpop.f32.mrb[0].mxu0 }
  0xf6   :  { %v807_v15 = vpop.f32.mrb[1].mxu0 }
  0xf7   :  { %v808_v16 = vadd.f32 %v807_v15, %v806_v13  ;;  %v809_v17 = vpop.f32.mrb[2].mxu0  ;;  %v828_v18 = vpop.f32.mrb[0].mxu1 }
  0xf8   :  { %v810_v19 = vpop.f32.mrb[3].mxu0  ;;  %v829_v20 = vpop.f32.mrb[1].mxu1 }
  0xf9   :  { %v541_v21 = vadd.f32 %v808_v16, %v738_v14  ;;  %v830_v22 = vadd.f32 %v829_v20, %v828_v18  ;;  %v831_v23 = vpop.f32.mrb[2].mxu1 }
  0xfa   :  { %v832_v24 = vpop.f32.mrb[3].mxu1 }
  0xfb   :  { %v581_v25 = vadd.f32 %v830_v22, %v541_v21 }
  0xff   :  { %v660_v26 = vpop.f32.mrb[4].mxu1 }
 0x100   :  { %v862_v27 = vpop.f32.mrb[5].mxu1 }
 0x101   :  { %v663_v28 = vpop.f32.mrb[6].mxu1 }
 0x102   :  { %v863_v29 = vpop.f32.mrb[7].mxu1 }
 0x115   :  { %v850_v30 = vpop.f32.mrb[4].mxu0 }
 0x116   :  { %v851_v31 = vpop.f32.mrb[5].mxu0 }
 0x117   :  { %v852_v32 = vadd.f32 %v851_v31, %v850_v30  ;;  %v853_v34 = vpop.f32.mrb[6].mxu0 }
 0x118   :  { %v854_v35 = vpop.f32.mrb[7].mxu0 }
 0x119   :  { %v621_v36 = vadd.f32 %v852_v32, %v581_v25 }
 0x11b   :  { %v661_v37 = vadd.f32 %v660_v26, %v621_v36 }
 0x11d   :  { %v667_v38 = vmul.f32 0.01, %v661_v37  ;;  %vm666_vm2 = vcmp.ge.f32.partialorder %v661_v37, 0.0 }
 0x11f   :  { %v668_v39 = vsel %vm666_vm2, %v661_v37, %v667_v38 }
 0x120   :  { %699 = vperm.xlu1 %875, %v668_v39   ;;  %673 = vperm.xlu0 %873, %v668_v39  }
 0x124   :  { %874 = vset.pattern.permute.xlu0 %v965_v40 }
 0x125   :  { %689 = vperm.xlu0 %874, %v668_v39  }
 0x129   :  { %876 = vset.pattern.permute.xlu0 %v963_v11 }
 0x19f   :  { %v674_v46 = vpop.permute.xlu0 %673  ;;  %v700_v51 = vpop.permute.xlu1 %699 }
 0x1a0   :  { %v680_v47 = vmul.f32 %v679_v43, %v674_v46  ;;  %v706_v55 = vmul.f32 %v705_v50, %v700_v51 }
 0x1a2   :  { %v687_v53 = vadd.f32 %v789_v49, %v680_v47 }
 0x1a4   :  { %v690_v52 = vpop.permute.xlu0 %689 }
 0x1a5   :  { %v696_v54 = vmul.f32 %v695_v48, %v690_v52 }
 0x1a7   :  { %v697_v56 = vadd.f32 %v696_v54, %v687_v53 }
 0x1a9   :  { %v707_v57 = vadd.f32 %v706_v55, %v697_v56 }
 0x1ab   :  { %v709_v58 = vsel %vm708_vm3, %v707_v57, -inf }
 0x1ac   :  { %710 = vmax.xlane.f32.xlu1 %v709_v58 }
 0x239   :  { %v711_v33 = vpop.xlane.xlu1 %710 }
 0x23a   :  { %v712_v59 = vsub.f32 %v707_v57, %v711_v33 }
 0x23c   :  { %v713_v60 = vmul.f32 1.442695, %v712_v59 }
 0x23e   :  { %932 = vpow2.f32 %v713_v60 }
 0x248   :  { %v933_v61 = vpop.eup %932 }
 0x249   :  { %v715_v62 = vsel %vm708_vm3, %v933_v61, 0.0 }
 0x24a   :  { %716 = vadd.xlane.f32.xlu0 %v715_v62 }
 0x2d7   :  { %v717_v63 = vpop.xlane.xlu0 %716 }
 0x2d8   :  { %934 = vlog2.f32 %v717_v63 }
 0x2e2   :  { %v935_v0 = vpop.eup %934 }
 0x2e3   :  { %v719_v1 = vmul.f32 0.6931472, %v935_v0 }
 0x2e5   :  { %v720_v2 = vsub.f32 %v712_v59, %v719_v1 }
 0x2e7   :  { %721 = vst.msk [vmem:[#allocation2] sm:$0xff] %vm708_vm3, %v720_v2 }
 0x2e8   :  { %726 = vsyncadd [#allocation3], 96  ;;  %s966_s3 = smov [#allocation2]  }
 0x2e9   :  { %s727_s4 = sshll.u32 %s966_s3, 4  ;;  %s728_s4 = int_to_ptr.vmem [resolvable:$true] %s727_s4 }
 0x2ea   :  { %s936_s26 = scalar_lea.vmem %s728_s4, 32  ;;  %s940_s27 = scalar_lea.vmem %s728_s4, 128 }
 0x2eb   :  { %p937_p0 = scmp.ne.s32.totalorder %s728_s4, %s936_s26  ;;  %p941_p1 = scmp.lt.s32.totalorder %s728_s4, %s728_s4 }
 0x2ec   :  { %p942_p2 = scmp.lt.s32.totalorder %s940_s27, %s936_s26 }
 0x2ee   :  { %p943_p3 = por %p942_p2, %p941_p1 }
 0x2f0   :  { %p944_p4 = pnand %p943_p3, %p937_p0 }
 0x2f2   :  { %947 = shalt.err (!%p944_p4)
}
 0x2f3   :  { %s948_s30 = scalar_lea.hbm %s1193_s5, 32 }
 0x2f4   :  { %p949_p5 = scmp.ne.s32.totalorder %s1193_s5, %s948_s30  ;;  %p952_p6 = scmp.lt.u32.totalorder %s948_s30, %s1193_s5 }
 0x2f6   :  { %p954_p7 = pnand %p952_p6, %p949_p5 }
 0x2f8   :  { %957 = shalt.err (!%p954_p7)
}
 0x2f9   :  { %s967_s10 = smov 32   ;;  %s968_s11 = smov 2  }
 0x2fa   :  { %733 = dma.vmem_to_hbm [thread:$0]  %s728_s4, 32, %s1193_s5, [#allocation3], %s967_s10, %s967_s10, %s968_s11  }
 0x2fb   :  { %958 = dma.done.wait [#allocation3], 128  }
 0x2fc   :  { %959 = vsyncadd [#allocation3], 4294967168 }
 0x2fd   :  { %737 = vsyncpa [#allocation3], 1 }

</bundles_post_ra>
